<compile_context>
chip_gen: v7x
topology: tpu7x:2x2x1
jax: 0.10.0
libtpu: 0.0.40
codegen_flags: <defaults>
</compile_context>

<pallas_src>
import jax
import jax.numpy as jnp
from jax.experimental import pallas as pl
from jax.experimental.pallas import tpu as pltpu


def _round_up(x, m):
    return ((x + m - 1) // m) * m


def _span_width_kernel(widths_ref, emb_ref, table_ref, out_ref):
    # widths_ref : (TR, 1)    int32
    # emb_ref    : (TR, H)    float
    # table_ref  : (V, D)     float
    # out_ref    : (TR, H+D)  float
    H = emb_ref.shape[1]
    V, D = table_ref.shape
    TR = widths_ref.shape[0]

    # Pass-through half of the concat: stream straight from the input tile.
    out_ref[:, :H] = emb_ref[...]

    widths = jnp.clip(widths_ref[...], 0, V - 1)                  # (TR, 1)

    if V <= 32:
        # Tiny vocab: V unrolled VPU selects per output vreg (no MXU, no
        # (TR, V) one-hot materialization).
        table = table_ref[...]                                    # (V, D)
        wemb = jnp.zeros((TR, D), table.dtype)
        for v in range(V):
            wemb = jnp.where(widths == v, table[v:v + 1, :], wemb)
    else:
        # Large vocab: one-hot gather on the MXU.
        lane_iota = jax.lax.broadcasted_iota(jnp.int32, (TR, V), 1)
        one_hot = (lane_iota == widths).astype(jnp.float32)
        wemb = jnp.dot(one_hot, table_ref[...].astype(jnp.float32),
                       preferred_element_type=jnp.float32)

    out_ref[:, H:] = wemb.astype(out_ref.dtype)


def span_width_embedder(spans, span_embeddings, embedding_table, *, row_tile=1024):
    """Pallas equivalent of SpanWidthEmbedder.forward."""
    B, N, two = spans.shape
    assert two == 2
    H = span_embeddings.shape[-1]
    V, D = embedding_table.shape
    out_dtype = span_embeddings.dtype

    rows = B * N
    # Trivial elementwise width computation stays in the wrapper: avoids a
    # poorly packed 2-lane (TR, 2) DMA per grid step inside the kernel.
    widths = (spans[..., 1] - spans[..., 0]).astype(jnp.int32).reshape(rows, 1)
    emb = span_embeddings.reshape(rows, H)

    # Large row tile (multiple of 8), capped by the padded number of rows.
    TR = min(row_tile, _round_up(rows, 8))
    TR = _round_up(TR, 8)
    rows_padded = _round_up(rows, TR)
    if rows_padded != rows:
        pad = rows_padded - rows
        widths = jnp.pad(widths, ((0, pad), (0, 0)))
        emb = jnp.pad(emb, ((0, pad), (0, 0)))

    out = pl.pallas_call(
        _span_width_kernel,
        out_shape=jax.ShapeDtypeStruct((rows_padded, H + D), out_dtype),
        grid=(rows_padded // TR,),
        in_specs=[
            pl.BlockSpec((TR, 1), lambda r: (r, 0)),
            pl.BlockSpec((TR, H), lambda r: (r, 0)),
            pl.BlockSpec((V, D), lambda r: (0, 0)),
        ],
        out_specs=pl.BlockSpec((TR, H + D), lambda r: (r, 0)),
        compiler_params=pltpu.CompilerParams(
            dimension_semantics=("parallel",)),
    )(widths, emb, embedding_table)

    return out[:rows].reshape(B, N, H + D)


if __name__ == "__main__":
    # Module hyper-parameters (match the PyTorch defaults).
    DIM = 20                 # embedding_dim
    NUM_WIDTH_EMB = 8        # num_width_embeddings (vocab size)

    # Small example shapes.
    B, N, H = 2, 8, 32

    key = jax.random.PRNGKey(0)
    k_tab, k_emb, k_start, k_width = jax.random.split(key, 4)

    embedding_table = jax.random.normal(k_tab, (NUM_WIDTH_EMB, DIM), jnp.float32)

    span_starts = jax.random.randint(k_start, (B, N), 0, 16, dtype=jnp.int32)
    span_widths = jax.random.randint(k_width, (B, N), 0, NUM_WIDTH_EMB,
                                     dtype=jnp.int32)
    spans = jnp.stack([span_starts, span_starts + span_widths], axis=-1)  # (B,N,2)
    span_embeddings = jax.random.normal(k_emb, (B, N, H), jnp.float32)

    def reference(sp, se, table):
        w = sp[:, :, 1] - sp[:, :, 0]
        wemb = jnp.take(table, w, axis=0)
        return jnp.concatenate([se, wemb], axis=-1)

    # Primary check (single row tile).
    out = jax.block_until_ready(
        span_width_embedder(spans, span_embeddings, embedding_table))
    ref = reference(spans, span_embeddings, embedding_table)
    assert out.shape == (B, N, H + DIM), out.shape
    assert jnp.allclose(out, ref, atol=1e-6), "mismatch vs reference (single tile)"

    # Secondary check: multiple grid steps + row padding (rows=22 -> 24, TR=8).
    B2, N2 = 2, 11
    k2 = jax.random.PRNGKey(0)
    ka, kb, kc = jax.random.split(jax.random.fold_in(k2, 1), 3)
    starts2 = jax.random.randint(ka, (B2, N2), 0, 16, dtype=jnp.int32)
    widths2 = jax.random.randint(kb, (B2, N2), 0, NUM_WIDTH_EMB, dtype=jnp.int32)
    spans2 = jnp.stack([starts2, starts2 + widths2], axis=-1)
    emb2 = jax.random.normal(kc, (B2, N2, H), jnp.float32)

    out2 = jax.block_until_ready(
        span_width_embedder(spans2, emb2, embedding_table, row_tile=8))
    ref2 = reference(spans2, emb2, embedding_table)
    assert out2.shape == (B2, N2, H + DIM), out2.shape
    assert jnp.allclose(out2, ref2, atol=1e-6), "mismatch vs reference (tiled)"

    print("KERNEL_OK")
</pallas_src>

<mosaic_0001>
module attributes {stable_mosaic.version = 11 : i64} {
  func.func @_span_width_kernel(%arg0: i32, %arg1: memref<16x1xi32, #tpu.memory_space<vmem>>, %arg2: memref<16x32xf32, #tpu.memory_space<vmem>>, %arg3: memref<8x20xf32, #tpu.memory_space<vmem>>, %arg4: memref<16x52xf32, #tpu.memory_space<vmem>>) attributes {dimension_semantics = [#tpu.dimension_semantics<parallel>], iteration_bounds = array<i64: 1>, scalar_prefetch = 0 : i64, scratch_operands = 0 : i64, tpu.core_type = #tpu.core_type<tc>, window_params = [{transform_indices = @transform_0, window_bounds = array<i64: 16, 1>}, {transform_indices = @transform_1, window_bounds = array<i64: 16, 32>}, {pipeline_mode = #tpu.pipeline_mode<synchronous>, transform_indices = @transform_2, window_bounds = array<i64: 8, 20>}, {transform_indices = @transform_3, window_bounds = array<i64: 16, 52>}]} {
    %c0 = arith.constant 0 : index
    %c0_0 = arith.constant 0 : index
    %0 = vector.load %arg2[%c0, %c0_0] : memref<16x32xf32, #tpu.memory_space<vmem>>, vector<16x32xf32>
    %c0_1 = arith.constant 0 : index
    %c0_2 = arith.constant 0 : index
    %1 = vector.load %arg4[%c0_1, %c0_2] : memref<16x52xf32, #tpu.memory_space<vmem>>, vector<16x32xf32>
    tpu.vector_store %arg4[%c0_1, %c0_2], %0 {strides = array<i32>} : memref<16x52xf32, #tpu.memory_space<vmem>>, vector<16x32xf32>,
    %c0_3 = arith.constant 0 : index
    %c0_4 = arith.constant 0 : index
    %2 = vector.load %arg1[%c0_3, %c0_4] : memref<16x1xi32, #tpu.memory_space<vmem>>, vector<16x1xi32>
    %c0_i32 = arith.constant 0 : i32
    %c7_i32 = arith.constant 7 : i32
    %3 = vector.broadcast %c0_i32 : i32 to vector<16x1xi32>
    %4 = arith.maxsi %3, %2 : vector<16x1xi32>
    %5 = vector.broadcast %c7_i32 : i32 to vector<16x1xi32>
    %6 = arith.minsi %5, %4 : vector<16x1xi32>
    %c0_5 = arith.constant 0 : index
    %c0_6 = arith.constant 0 : index
    %7 = vector.load %arg3[%c0_5, %c0_6] : memref<8x20xf32, #tpu.memory_space<vmem>>, vector<8x20xf32>
    %cst = arith.constant 0.000000e+00 : f32
    %8 = vector.broadcast %cst : f32 to vector<16x20xf32>
    %c0_i32_7 = arith.constant 0 : i32
    %9 = vector.broadcast %c0_i32_7 : i32 to vector<16x1xi32>
    %10 = arith.cmpi eq, %6, %9 : vector<16x1xi32>
    %11 = vector.extract_strided_slice %7 {offsets = [0, 0], sizes = [1, 20], strides = [1, 1]} : vector<8x20xf32> to vector<1x20xf32>
    %12 = vector.shape_cast %10 : vector<16x1xi1> to vector<16x1xi1>
    %13 = vector.broadcast %12 : vector<16x1xi1> to vector<16x20xi1>
    %14 = vector.shape_cast %11 : vector<1x20xf32> to vector<1x20xf32>
    %15 = vector.broadcast %14 : vector<1x20xf32> to vector<16x20xf32>
    %16 = arith.select %13, %15, %8 : vector<16x20xi1>, vector<16x20xf32>
    %c1_i32 = arith.constant 1 : i32
    %17 = vector.broadcast %c1_i32 : i32 to vector<16x1xi32>
    %18 = arith.cmpi eq, %6, %17 : vector<16x1xi32>
    %19 = vector.extract_strided_slice %7 {offsets = [1, 0], sizes = [1, 20], strides = [1, 1]} : vector<8x20xf32> to vector<1x20xf32>
    %20 = vector.shape_cast %18 : vector<16x1xi1> to vector<16x1xi1>
    %21 = vector.broadcast %20 : vector<16x1xi1> to vector<16x20xi1>
    %22 = vector.shape_cast %19 : vector<1x20xf32> to vector<1x20xf32>
    %23 = vector.broadcast %22 : vector<1x20xf32> to vector<16x20xf32>
    %24 = arith.select %21, %23, %16 : vector<16x20xi1>, vector<16x20xf32>
    %c2_i32 = arith.constant 2 : i32
    %25 = vector.broadcast %c2_i32 : i32 to vector<16x1xi32>
    %26 = arith.cmpi eq, %6, %25 : vector<16x1xi32>
    %27 = vector.extract_strided_slice %7 {offsets = [2, 0], sizes = [1, 20], strides = [1, 1]} : vector<8x20xf32> to vector<1x20xf32>
    %28 = vector.shape_cast %26 : vector<16x1xi1> to vector<16x1xi1>
    %29 = vector.broadcast %28 : vector<16x1xi1> to vector<16x20xi1>
    %30 = vector.shape_cast %27 : vector<1x20xf32> to vector<1x20xf32>
    %31 = vector.broadcast %30 : vector<1x20xf32> to vector<16x20xf32>
    %32 = arith.select %29, %31, %24 : vector<16x20xi1>, vector<16x20xf32>
    %c3_i32 = arith.constant 3 : i32
    %33 = vector.broadcast %c3_i32 : i32 to vector<16x1xi32>
    %34 = arith.cmpi eq, %6, %33 : vector<16x1xi32>
    %35 = vector.extract_strided_slice %7 {offsets = [3, 0], sizes = [1, 20], strides = [1, 1]} : vector<8x20xf32> to vector<1x20xf32>
    %36 = vector.shape_cast %34 : vector<16x1xi1> to vector<16x1xi1>
    %37 = vector.broadcast %36 : vector<16x1xi1> to vector<16x20xi1>
    %38 = vector.shape_cast %35 : vector<1x20xf32> to vector<1x20xf32>
    %39 = vector.broadcast %38 : vector<1x20xf32> to vector<16x20xf32>
    %40 = arith.select %37, %39, %32 : vector<16x20xi1>, vector<16x20xf32>
    %c4_i32 = arith.constant 4 : i32
    %41 = vector.broadcast %c4_i32 : i32 to vector<16x1xi32>
    %42 = arith.cmpi eq, %6, %41 : vector<16x1xi32>
    %43 = vector.extract_strided_slice %7 {offsets = [4, 0], sizes = [1, 20], strides = [1, 1]} : vector<8x20xf32> to vector<1x20xf32>
    %44 = vector.shape_cast %42 : vector<16x1xi1> to vector<16x1xi1>
    %45 = vector.broadcast %44 : vector<16x1xi1> to vector<16x20xi1>
    %46 = vector.shape_cast %43 : vector<1x20xf32> to vector<1x20xf32>
    %47 = vector.broadcast %46 : vector<1x20xf32> to vector<16x20xf32>
    %48 = arith.select %45, %47, %40 : vector<16x20xi1>, vector<16x20xf32>
    %c5_i32 = arith.constant 5 : i32
    %49 = vector.broadcast %c5_i32 : i32 to vector<16x1xi32>
    %50 = arith.cmpi eq, %6, %49 : vector<16x1xi32>
    %51 = vector.extract_strided_slice %7 {offsets = [5, 0], sizes = [1, 20], strides = [1, 1]} : vector<8x20xf32> to vector<1x20xf32>
    %52 = vector.shape_cast %50 : vector<16x1xi1> to vector<16x1xi1>
    %53 = vector.broadcast %52 : vector<16x1xi1> to vector<16x20xi1>
    %54 = vector.shape_cast %51 : vector<1x20xf32> to vector<1x20xf32>
    %55 = vector.broadcast %54 : vector<1x20xf32> to vector<16x20xf32>
    %56 = arith.select %53, %55, %48 : vector<16x20xi1>, vector<16x20xf32>
    %c6_i32 = arith.constant 6 : i32
    %57 = vector.broadcast %c6_i32 : i32 to vector<16x1xi32>
    %58 = arith.cmpi eq, %6, %57 : vector<16x1xi32>
    %59 = vector.extract_strided_slice %7 {offsets = [6, 0], sizes = [1, 20], strides = [1, 1]} : vector<8x20xf32> to vector<1x20xf32>
    %60 = vector.shape_cast %58 : vector<16x1xi1> to vector<16x1xi1>
    %61 = vector.broadcast %60 : vector<16x1xi1> to vector<16x20xi1>
    %62 = vector.shape_cast %59 : vector<1x20xf32> to vector<1x20xf32>
    %63 = vector.broadcast %62 : vector<1x20xf32> to vector<16x20xf32>
    %64 = arith.select %61, %63, %56 : vector<16x20xi1>, vector<16x20xf32>
    %c7_i32_8 = arith.constant 7 : i32
    %65 = vector.broadcast %c7_i32_8 : i32 to vector<16x1xi32>
    %66 = arith.cmpi eq, %6, %65 : vector<16x1xi32>
    %67 = vector.extract_strided_slice %7 {offsets = [7, 0], sizes = [1, 20], strides = [1, 1]} : vector<8x20xf32> to vector<1x20xf32>
    %68 = vector.shape_cast %66 : vector<16x1xi1> to vector<16x1xi1>
    %69 = vector.broadcast %68 : vector<16x1xi1> to vector<16x20xi1>
    %70 = vector.shape_cast %67 : vector<1x20xf32> to vector<1x20xf32>
    %71 = vector.broadcast %70 : vector<1x20xf32> to vector<16x20xf32>
    %72 = arith.select %69, %71, %64 : vector<16x20xi1>, vector<16x20xf32>
    %c0_9 = arith.constant 0 : index
    %c32 = arith.constant 32 : index
    %73 = vector.load %arg4[%c0_9, %c32] : memref<16x52xf32, #tpu.memory_space<vmem>>, vector<16x20xf32>
    tpu.vector_store %arg4[%c0_9, %c32], %72 {strides = array<i32>} : memref<16x52xf32, #tpu.memory_space<vmem>>, vector<16x20xf32>,
    return
  }
  func.func @transform_0(%arg0: i32) -> (i32, i32) {
    %c0_i32 = arith.constant 0 : i32
    %c0_i32_0 = arith.constant 0 : i32
    return %arg0, %c0_i32 : i32, i32
  }
  func.func @transform_1(%arg0: i32) -> (i32, i32) {
    %c0_i32 = arith.constant 0 : i32
    %c0_i32_0 = arith.constant 0 : i32
    return %arg0, %c0_i32 : i32, i32
  }
  func.func @transform_2(%arg0: i32) -> (i32, i32) {
    %c0_i32 = arith.constant 0 : i32
    %c0_i32_0 = arith.constant 0 : i32
    %c0_i32_1 = arith.constant 0 : i32
    return %c0_i32, %c0_i32_0 : i32, i32
  }
  func.func @transform_3(%arg0: i32) -> (i32, i32) {
    %c0_i32 = arith.constant 0 : i32
    %c0_i32_0 = arith.constant 0 : i32
    return %arg0, %c0_i32 : i32, i32
  }
}

</mosaic_0001>

<bundles_post_ra>
// kernel: tpu_custom_call.1
= control target key start
LH: loop header
LB: loop body
LE: loop exit
PB: predicated region body
PF: predicated region fallthrough
CT: control target
= control target key end

     0   :  { %s285_s0 = inlined_call_operand.vmem [shape: s32[16,1], index: 0, kind: input, shape index: {}]   ;;  %s286_s1 = inlined_call_operand.vmem [shape: f32[16,32], index: 1, kind: input, shape index: {}]   ;;  %s287_s2 = inlined_call_operand.vmem [shape: f32[8,20], index: 2, kind: input, shape index: {}]   ;;  %s288_s3 = inlined_call_operand.hbm [shape: f32[16,52], index: 3, kind: output, shape index: {}]  }
   0x1   :  { %v20_v0 = vld [vmem:[%s285_s0] sm:$0xff]  ;;  %v21_v1 = vld [vmem:[%s285_s0 + $0x8] sm:$0xff] }
   0x2   :  { %8 = vsyncpa [#allocation3], 0  ;;  %v233_v2 = vmov 0   ;;  %vm22_vm0 = vcmp.gt.s32.totalorder %v20_v0, 0  ;;  %vm24_vm1 = vcmp.gt.s32.totalorder %v21_v1, 0  ;;  %v43_v27 = vlaneseq  ;;  %v30_v34 = vld [vmem:[%s287_s2] sm:$0xff] }
   0x3   :  { %208 = vset.pattern.permute.xlu1 %v233_v2  ;;  %207 = vset.pattern.permute.xlu0 %v233_v2  ;;  %v23_v3 = vsel %vm22_vm0, %v20_v0, 0  ;;  %v25_v4 = vsel %vm24_vm1, %v21_v1, 0  ;;  %v16_v40 = vld [vmem:[%s286_s1 + $0x8] sm:$0xff]  ;;  %v15_v41 = vld [vmem:[%s286_s1] sm:$0xff]  ;;  %s234_s1 = smov 32   ;;  %s235_s2 = smov [#allocation2]  }
   0x4   :  { %vm26_vm2 = vcmp.lt.s32.totalorder %v23_v3, 7  ;;  %vm28_vm3 = vcmp.lt.s32.totalorder %v25_v4, 7  ;;  %v44_v30 = vshrl.u32 %v43_v27, 7  ;;  %s191_s21 = sshll.u32 %s235_s2, 4  ;;  %s192_s21 = int_to_ptr.vmem [resolvable:$true] %s191_s21 }
   0x5   :  { %v27_v5 = vsel %vm26_vm2, %v23_v3, 7  ;;  %v29_v6 = vsel %vm28_vm3, %v25_v4, 7  ;;  %s209_s22 = scalar_lea.vmem %s192_s21, 256  ;;  %p214_p1 = scmp.lt.s32.totalorder %s192_s21, %s192_s21 }
   0x6   :  { %vm49_vm4 = vcmp.eq.s32.totalorder %v27_v5, 1  ;;  %vm31_vm5 = vcmp.eq.s32.totalorder %v27_v5, 0  ;;  %vm50_vm6 = vcmp.eq.s32.totalorder %v29_v6, 1  ;;  %vm32_vm7 = vcmp.eq.s32.totalorder %v29_v6, 0  ;;  %p210_p0 = scmp.ne.s32.totalorder %s192_s21, %s209_s22  ;;  %p215_p2 = scmp.lt.s32.totalorder %s209_s22, %s209_s22 }
   0x7   :  { %v51_v7 = vsel %vm49_vm4, 1, %v233_v2  ;;  %v33_v8 = vsel %vm31_vm5, 1, %v233_v2  ;;  %v52_v9 = vsel %vm50_vm6, 1, %v233_v2  ;;  %v34_v10 = vsel %vm32_vm7, 1, %v233_v2 }
   0x8   :  { %54 = vperm.xlu1 %208, %v51_v7   ;;  %36 = vperm.xlu0 %207, %v33_v8   ;;  %vm68_vm8 = vcmp.eq.s32.totalorder %v29_v6, 2  ;;  %vm67_vm9 = vcmp.eq.s32.totalorder %v27_v5, 2  ;;  %vm86_vm10 = vcmp.eq.s32.totalorder %v29_v6, 3  ;;  %vm85_vm11 = vcmp.eq.s32.totalorder %v27_v5, 3  ;;  %p216_p3 = por %p215_p2, %p214_p1 }
   0x9   :  { %v70_v11 = vsel %vm68_vm8, 1, %v233_v2  ;;  %v69_v12 = vsel %vm67_vm9, 1, %v233_v2  ;;  %v88_v13 = vsel %vm86_vm10, 1, %v233_v2  ;;  %v87_v14 = vsel %vm85_vm11, 1, %v233_v2 }
   0xa   :  { %vm104_vm12 = vcmp.eq.s32.totalorder %v29_v6, 4  ;;  %vm103_vm13 = vcmp.eq.s32.totalorder %v27_v5, 4  ;;  %vm122_vm14 = vcmp.eq.s32.totalorder %v29_v6, 5  ;;  %vm121_vm15 = vcmp.eq.s32.totalorder %v27_v5, 5  ;;  %p217_p4 = pnand %p216_p3, %p210_p0 }
   0xb   :  { %v106_v15 = vsel %vm104_vm12, 1, %v233_v2  ;;  %v105_v16 = vsel %vm103_vm13, 1, %v233_v2  ;;  %v124_v17 = vsel %vm122_vm14, 1, %v233_v2  ;;  %v123_v18 = vsel %vm121_vm15, 1, %v233_v2 }
   0xc   :  { %57 = vperm.xlu1 %208, %v52_v9   ;;  %39 = vperm.xlu0 %207, %v34_v10   ;;  %vm140_vm0 = vcmp.eq.s32.totalorder %v29_v6, 6  ;;  %vm139_vm1 = vcmp.eq.s32.totalorder %v27_v5, 6  ;;  %vm158_vm2 = vcmp.eq.s32.totalorder %v29_v6, 7  ;;  %vm157_vm3 = vcmp.eq.s32.totalorder %v27_v5, 7 }
   0xd   :  { %v142_v19 = vsel %vm140_vm0, 1, %v233_v2  ;;  %v141_v20 = vsel %vm139_vm1, 1, %v233_v2  ;;  %v160_v21 = vsel %vm158_vm2, 1, %v233_v2  ;;  %v159_v22 = vsel %vm157_vm3, 1, %v233_v2 }
   0xe   :  { %v45_v33 = vsub.s32 0, %v44_v30  ;;  %v63_v35 = vsub.s32 1, %v44_v30  ;;  %v81_v36 = vsub.s32 2, %v44_v30  ;;  %v99_v37 = vsub.s32 3, %v44_v30 }
   0xf   :  { %vm17_vm4 = vcmask 261120   ;;  %v117_v43 = vsub.s32 4, %v44_v30  ;;  %v135_v44 = vsub.s32 5, %v44_v30  ;;  %v153_v45 = vsub.s32 6, %v44_v30 }
  0x10   :  { %75 = vperm.xlu1 %208, %v70_v11   ;;  %72 = vperm.xlu0 %207, %v69_v12   ;;  %v46_v42 = vrot.slane %v30_v34, %v45_v33  ;;  %19 = vst.msk [vmem:[#allocation2 + $0x8] sm:$0xff] %vm17_vm4, %v16_v40  ;;  %18 = vst.msk [vmem:[#allocation2] sm:$0xff] %vm17_vm4, %v15_v41  ;;  %v171_v46 = vsub.s32 7, %v44_v30  ;;  %v64_v47 = vrot.slane %v30_v34, %v63_v35 }
  0x11   :  { %v82_v48 = vrot.slane %v30_v34, %v81_v36  ;;  %v100_v49 = vrot.slane %v30_v34, %v99_v37  ;;  %v118_v54 = vrot.slane %v30_v34, %v117_v43  ;;  %v136_v55 = vrot.slane %v30_v34, %v135_v44 }
  0x12   :  { %v154_v56 = vrot.slane %v30_v34, %v153_v45  ;;  %v172_v57 = vrot.slane %v30_v34, %v171_v46 }
  0x14   :  { %93 = vperm.xlu1 %208, %v88_v13   ;;  %90 = vperm.xlu0 %207, %v87_v14  }
  0x18   :  { %111 = vperm.xlu1 %208, %v106_v15   ;;  %108 = vperm.xlu0 %207, %v105_v16  }
  0x1c   :  { %129 = vperm.xlu1 %208, %v124_v17   ;;  %126 = vperm.xlu0 %207, %v123_v18  }
  0x20   :  { %147 = vperm.xlu1 %208, %v142_v19   ;;  %144 = vperm.xlu0 %207, %v141_v20  }
  0x24   :  { %165 = vperm.xlu1 %208, %v160_v21   ;;  %162 = vperm.xlu0 %207, %v159_v22  }
  0x87   :  { %v55_v23 = vpop.permute.xlu1 %54  ;;  %v37_v24 = vpop.permute.xlu0 %36 }
  0x88   :  { %vm41_vm5 = vcmp.eq.s32.totalorder %v37_v24, 1  ;;  %vm59_vm7 = vcmp.eq.s32.totalorder %v55_v23, 1 }
  0x89   :  { %v47_v52 = vsel %vm41_vm5, %v46_v42, 0.0  ;;  %vm183_vm5 = vcmask 425216  }
  0x8a   :  { %v65_v58 = vsel %vm59_vm7, %v64_v47, %v47_v52 }
  0x8b   :  { %v58_v25 = vpop.permute.xlu1 %57  ;;  %v40_v26 = vpop.permute.xlu0 %39 }
  0x8c   :  { %vm42_vm6 = vcmp.eq.s32.totalorder %v40_v26, 1  ;;  %vm60_vm8 = vcmp.eq.s32.totalorder %v58_v25, 1 }
  0x8d   :  { %v48_v53 = vsel %vm42_vm6, %v46_v42, 0.0 }
  0x8e   :  { %v66_v59 = vsel %vm60_vm8, %v64_v47, %v48_v53 }
  0x8f   :  { %v76_v28 = vpop.permute.xlu1 %75  ;;  %v73_v29 = vpop.permute.xlu0 %72 }
  0x90   :  { %vm78_vm9 = vcmp.eq.s32.totalorder %v76_v28, 1  ;;  %vm77_vm10 = vcmp.eq.s32.totalorder %v73_v29, 1 }
  0x91   :  { %v84_v62 = vsel %vm78_vm9, %v82_v48, %v66_v59  ;;  %v83_v63 = vsel %vm77_vm10, %v82_v48, %v65_v58 }
  0x93   :  { %v94_v31 = vpop.permute.xlu1 %93  ;;  %v91_v32 = vpop.permute.xlu0 %90 }
  0x94   :  { %vm96_vm11 = vcmp.eq.s32.totalorder %v94_v31, 1  ;;  %vm95_vm12 = vcmp.eq.s32.totalorder %v91_v32, 1 }
  0x95   :  { %v102_v0 = vsel %vm96_vm11, %v100_v49, %v84_v62  ;;  %v101_v1 = vsel %vm95_vm12, %v100_v49, %v83_v63 }
  0x97   :  { %v112_v38 = vpop.permute.xlu1 %111  ;;  %v109_v39 = vpop.permute.xlu0 %108 }
  0x98   :  { %vm114_vm13 = vcmp.eq.s32.totalorder %v112_v38, 1  ;;  %vm113_vm14 = vcmp.eq.s32.totalorder %v109_v39, 1 }
  0x99   :  { %v120_v2 = vsel %vm114_vm13, %v118_v54, %v102_v0  ;;  %v119_v3 = vsel %vm113_vm14, %v118_v54, %v101_v1 }
  0x9b   :  { %v130_v50 = vpop.permute.xlu1 %129  ;;  %v127_v51 = vpop.permute.xlu0 %126 }
  0x9c   :  { %vm132_vm15 = vcmp.eq.s32.totalorder %v130_v50, 1  ;;  %vm131_vm0 = vcmp.eq.s32.totalorder %v127_v51, 1 }
  0x9d   :  { %v138_v4 = vsel %vm132_vm15, %v136_v55, %v120_v2  ;;  %v137_v5 = vsel %vm131_vm0, %v136_v55, %v119_v3 }
  0x9f   :  { %v148_v60 = vpop.permute.xlu1 %147  ;;  %v145_v61 = vpop.permute.xlu0 %144 }
  0xa0   :  { %vm150_vm1 = vcmp.eq.s32.totalorder %v148_v60, 1  ;;  %vm149_vm2 = vcmp.eq.s32.totalorder %v145_v61, 1 }
  0xa1   :  { %v156_v8 = vsel %vm150_vm1, %v154_v56, %v138_v4  ;;  %v155_v9 = vsel %vm149_vm2, %v154_v56, %v137_v5 }
  0xa3   :  { %v166_v6 = vpop.permute.xlu1 %165  ;;  %v163_v7 = vpop.permute.xlu0 %162 }
  0xa4   :  { %vm168_vm3 = vcmp.eq.s32.totalorder %v166_v6, 1  ;;  %vm167_vm4 = vcmp.eq.s32.totalorder %v163_v7, 1 }
  0xa5   :  { %v174_v10 = vsel %vm168_vm3, %v172_v57, %v156_v8  ;;  %v173_v11 = vsel %vm167_vm4, %v172_v57, %v155_v9 }
  0xa6   :  { %179 = vrot.lane.b32.xlu1 %v174_v10, %s234_s1  ;;  %177 = vrot.lane.b32.xlu0 %v173_v11, %s234_s1 }
 0x118   :  { %v180_v12 = vpop.permute.xlu1 %179  ;;  %v178_v13 = vpop.permute.xlu0 %177 }
 0x119   :  { %185 = vst.msk [vmem:[#allocation2 + $0x8] sm:$0xff] %vm183_vm5, %v180_v12  ;;  %184 = vst.msk [vmem:[#allocation2] sm:$0xff] %vm183_vm5, %v178_v13 }
 0x11a   :  { %220 = shalt.err (!%p217_p4)
}
 0x11b   :  { %s221_s25 = scalar_lea.hbm %s288_s3, 256 }
 0x11c   :  { %p222_p5 = scmp.ne.s32.totalorder %s288_s3, %s221_s25  ;;  %p225_p6 = scmp.lt.u32.totalorder %s221_s25, %s288_s3 }
 0x11e   :  { %p227_p7 = pnand %p225_p6, %p222_p5 }
 0x120   :  { %230 = shalt.err (!%p227_p7)
}
 0x121   :  { %s236_s30 = smov 128   ;;  %s237_s4 = smov 8  }
 0x122   :  { %197 = dma.vmem_to_hbm [thread:$0]  %s192_s21, 256, %s288_s3, [#allocation3], %s236_s30, %s236_s30, %s237_s4  }
 0x123   :  { %231 = dma.done.wait [#allocation3], 256  }
 0x124   :  { %232 = vsyncadd [#allocation3], 4294967040 }
 0x125   :  { %201 = vsyncpa [#allocation3], 1 }

</bundles_post_ra>
